<compile_context>
chip_gen: v6e
topology: v6e:2x2x1
jax: 0.10.0
libtpu: 0.0.40
codegen_flags: <defaults>
</compile_context>

<pallas_src>
import jax
import jax.numpy as jnp
from jax.experimental import pallas as pl
from jax.experimental.pallas import tpu as pltpu


def _make_layernorm_kernel(true_d: int, d_pad: int, eps: float):
    """Build a LayerNorm kernel body for a (possibly) lane-padded feature axis."""
    need_mask = d_pad != true_d
    inv_d = 1.0 / float(true_d)

    def kernel(x_ref, scale_ref, shift_ref, o_ref):
        # Compute statistics in f32 regardless of input dtype.
        x = x_ref[...].astype(jnp.float32)                       # (TB, Dp)
        if need_mask:
            lane = jax.lax.broadcasted_iota(jnp.int32, x.shape, dimension=1)
            valid = lane < true_d
            x = jnp.where(valid, x, 0.0)                         # zero the pad lanes
        mean = jnp.sum(x, axis=-1, keepdims=True) * inv_d        # divide by true d
        centered = x - mean
        if need_mask:
            centered = jnp.where(valid, centered, 0.0)           # keep pad out of var
        var = jnp.sum(centered * centered, axis=-1, keepdims=True) * inv_d  # biased
        inv_std = jax.lax.rsqrt(var + eps)                       # EUP slot — ~free
        y = (scale_ref[...].astype(jnp.float32) * (centered * inv_std)
             + shift_ref[...].astype(jnp.float32))
        o_ref[...] = y.astype(o_ref.dtype)                       # lane-dense full-tile store

    return kernel


def layer_norm(x, scale, shift, *, eps=1e-5, vmem_budget_bytes=20 << 20, max_rows=2048):
    """x: (batch, emb_dim); scale, shift: (emb_dim,). Returns (batch, emb_dim)."""
    b, d = x.shape
    itemsize = jnp.dtype(x.dtype).itemsize

    # Native sublane packing: f32 -> 8, bf16/f16 -> 16, int8/fp8 -> 32.
    if itemsize == 1:
        sublane = 32
    elif itemsize == 2:
        sublane = 16
    else:
        sublane = 8

    # Lane-dense feature axis: pad to a multiple of 128 (masked out of the stats).
    d_pad = pl.cdiv(d, 128) * 128
    if d_pad != d:
        x_p = jnp.pad(x, ((0, 0), (0, d_pad - d)))
        scale_p = jnp.pad(scale, (0, d_pad - d))
        shift_p = jnp.pad(shift, (0, d_pad - d))
    else:
        x_p, scale_p, shift_p = x, scale, shift
    scale2d = scale_p.reshape(1, d_pad)
    shift2d = shift_p.reshape(1, d_pad)

    # Working set per row: double-buffered input + output blocks plus ~3 (TB, Dp)
    # f32 intermediates materialized inside the body.
    bytes_per_row = 4 * d_pad * itemsize + 3 * d_pad * 4
    tb_max = vmem_budget_bytes // max(bytes_per_row, 1)
    tb_max = min(max_rows, max(sublane, (tb_max // sublane) * sublane))

    if b <= sublane:
        # Tiny batch: single full-extent tile (full-array-dim escape hatch).
        tb = b
    else:
        num_tiles = pl.cdiv(b, tb_max)
        # Megacore (v7x): make sure both TensorCores get grid steps, and double
        # buffering of input/output DMAs is actually engaged.
        if num_tiles < 2:
            num_tiles = 2
        tb = pl.cdiv(b, num_tiles)
        tb = max(sublane, pl.cdiv(tb, sublane) * sublane)        # near-divisor of b

    grid = (pl.cdiv(b, tb),)

    # Scoped-VMEM limit = true working set + headroom, capped below v7x's 64 MiB physical.
    block_io_bytes = 2 * 2 * tb * d_pad * itemsize               # 2-deep in + out buffers
    interm_bytes = 3 * tb * d_pad * 4                            # f32 temps
    param_bytes = 2 * 2 * d_pad * max(itemsize, 4)               # resident scale/shift
    vmem_limit = block_io_bytes + interm_bytes + param_bytes + (4 << 20)
    vmem_limit = int(min(max(vmem_limit, 16 << 20), 48 << 20))

    out_padded = pl.pallas_call(
        _make_layernorm_kernel(d, d_pad, eps),
        out_shape=jax.ShapeDtypeStruct((b, d_pad), x.dtype),
        grid=grid,
        in_specs=[
            pl.BlockSpec((tb, d_pad), lambda i: (i, 0)),   # x: streamed row tiles
            pl.BlockSpec((1, d_pad), lambda i: (0, 0)),    # scale: resident across grid
            pl.BlockSpec((1, d_pad), lambda i: (0, 0)),    # shift: resident across grid
        ],
        out_specs=pl.BlockSpec((tb, d_pad), lambda i: (i, 0)),
        compiler_params=pltpu.CompilerParams(
            dimension_semantics=(pltpu.PARALLEL,),         # split batch tiles across TCs
            vmem_limit_bytes=vmem_limit,
        ),
    )(x_p, scale2d, shift2d)

    if d_pad != d:
        out_padded = out_padded[:, :d]
    return out_padded


def _reference(x, scale, shift, eps=1e-5):
    mean = jnp.mean(x, axis=-1, keepdims=True)
    var = jnp.mean((x - mean) ** 2, axis=-1, keepdims=True)
    return scale * (x - mean) / jnp.sqrt(var + eps) + shift


if __name__ == "__main__":
    key = jax.random.PRNGKey(0)

    # Shapes from the spec: batch_example = torch.rand(2, 5), LayerNorm(emb_dim=5).
    batch, emb_dim = 2, 5
    x = jax.random.uniform(key, (batch, emb_dim), dtype=jnp.float32)
    scale = jnp.ones((emb_dim,), dtype=jnp.float32)   # nn.Parameter(torch.ones)
    shift = jnp.zeros((emb_dim,), dtype=jnp.float32)  # nn.Parameter(torch.zeros)

    out = layer_norm(x, scale, shift)
    jax.block_until_ready(out)
    assert out.shape == x.shape
    assert jnp.allclose(out, _reference(x, scale, shift), atol=1e-5, rtol=1e-5)

    # Moderate shape to exercise the tiled / multi-step (megacore-split) path:
    # d is lane-dense, batch forces >= 2 grid steps with near-divisor tiles.
    k2 = jax.random.PRNGKey(0)
    b2, d2 = 1024, 512
    x2 = jax.random.normal(k2, (b2, d2), dtype=jnp.float32)
    s2 = jnp.ones((d2,), dtype=jnp.float32)
    t2 = jnp.zeros((d2,), dtype=jnp.float32)
    out2 = layer_norm(x2, s2, t2)
    jax.block_until_ready(out2)
    assert jnp.allclose(out2, _reference(x2, s2, t2), atol=1e-4, rtol=1e-4)

    print("KERNEL_OK")
</pallas_src>

<mosaic_0001>
module attributes {stable_mosaic.version = 11 : i64} {
  func.func @kernel(%arg0: i32, %arg1: memref<2x128xf32, #tpu.memory_space<vmem>>, %arg2: memref<1x128xf32, #tpu.memory_space<vmem>>, %arg3: memref<1x128xf32, #tpu.memory_space<vmem>>, %arg4: memref<2x128xf32, #tpu.memory_space<vmem>>) attributes {dimension_semantics = [#tpu.dimension_semantics<parallel>], iteration_bounds = array<i64: 1>, scalar_prefetch = 0 : i64, scratch_operands = 0 : i64, tpu.core_type = #tpu.core_type<tc>, window_params = [{transform_indices = @transform_0, window_bounds = array<i64: 2, 128>}, {pipeline_mode = #tpu.pipeline_mode<synchronous>, transform_indices = @transform_1, window_bounds = array<i64: 1, 128>}, {pipeline_mode = #tpu.pipeline_mode<synchronous>, transform_indices = @transform_2, window_bounds = array<i64: 1, 128>}, {transform_indices = @transform_3, window_bounds = array<i64: 2, 128>}]} {
    %c0 = arith.constant 0 : index
    %c0_0 = arith.constant 0 : index
    %0 = vector.load %arg1[%c0, %c0_0] : memref<2x128xf32, #tpu.memory_space<vmem>>, vector<2x128xf32>
    %1 = tpu.iota {dimensions = array<i32: 1>} : vector<2x128xi32>
    %c5_i32 = arith.constant 5 : i32
    %2 = vector.broadcast %c5_i32 : i32 to vector<2x128xi32>
    %3 = arith.cmpi slt, %1, %2 : vector<2x128xi32>
    %cst = arith.constant 0.000000e+00 : f32
    %4 = vector.broadcast %cst : f32 to vector<2x128xf32>
    %5 = arith.select %3, %0, %4 : vector<2x128xi1>, vector<2x128xf32>
    %cst_1 = arith.constant dense<0.000000e+00> : vector<2xf32>
    %6 = vector.multi_reduction <add>, %5, %cst_1 [1] : vector<2x128xf32> to vector<2xf32>
    %7 = vector.shape_cast %6 : vector<2xf32> to vector<2x1xf32>
    %cst_2 = arith.constant 2.000000e-01 : f32
    %8 = vector.broadcast %cst_2 : f32 to vector<2x1xf32>
    %9 = arith.mulf %7, %8 : vector<2x1xf32>
    %10 = vector.broadcast %9 : vector<2x1xf32> to vector<2x128xf32>
    %11 = arith.subf %5, %10 : vector<2x128xf32>
    %cst_3 = arith.constant 0.000000e+00 : f32
    %12 = vector.broadcast %cst_3 : f32 to vector<2x128xf32>
    %13 = arith.select %3, %11, %12 : vector<2x128xi1>, vector<2x128xf32>
    %14 = arith.mulf %13, %13 : vector<2x128xf32>
    %cst_4 = arith.constant dense<0.000000e+00> : vector<2xf32>
    %15 = vector.multi_reduction <add>, %14, %cst_4 [1] : vector<2x128xf32> to vector<2xf32>
    %16 = vector.shape_cast %15 : vector<2xf32> to vector<2x1xf32>
    %cst_5 = arith.constant 2.000000e-01 : f32
    %17 = vector.broadcast %cst_5 : f32 to vector<2x1xf32>
    %18 = arith.mulf %16, %17 : vector<2x1xf32>
    %cst_6 = arith.constant 9.99999974E-6 : f32
    %19 = vector.broadcast %cst_6 : f32 to vector<2x1xf32>
    %20 = arith.addf %18, %19 : vector<2x1xf32>
    %21 = math.rsqrt %20 : vector<2x1xf32>
    %c0_7 = arith.constant 0 : index
    %c0_8 = arith.constant 0 : index
    %22 = vector.load %arg2[%c0_7, %c0_8] : memref<1x128xf32, #tpu.memory_space<vmem>>, vector<1x128xf32>
    %23 = vector.broadcast %21 : vector<2x1xf32> to vector<2x128xf32>
    %24 = arith.mulf %13, %23 : vector<2x128xf32>
    %25 = vector.broadcast %22 : vector<1x128xf32> to vector<2x128xf32>
    %26 = arith.mulf %25, %24 : vector<2x128xf32>
    %c0_9 = arith.constant 0 : index
    %c0_10 = arith.constant 0 : index
    %27 = vector.load %arg3[%c0_9, %c0_10] : memref<1x128xf32, #tpu.memory_space<vmem>>, vector<1x128xf32>
    %28 = vector.broadcast %27 : vector<1x128xf32> to vector<2x128xf32>
    %29 = arith.addf %26, %28 : vector<2x128xf32>
    %c0_11 = arith.constant 0 : index
    %c0_12 = arith.constant 0 : index
    %30 = vector.load %arg4[%c0_11, %c0_12] : memref<2x128xf32, #tpu.memory_space<vmem>>, vector<2x128xf32>
    tpu.vector_store %arg4[%c0_11, %c0_12], %29 {strides = array<i32>} : memref<2x128xf32, #tpu.memory_space<vmem>>, vector<2x128xf32>,
    return
  }
  func.func @transform_0(%arg0: i32) -> (i32, i32) {
    %c0_i32 = arith.constant 0 : i32
    %c0_i32_0 = arith.constant 0 : i32
    return %arg0, %c0_i32 : i32, i32
  }
  func.func @transform_1(%arg0: i32) -> (i32, i32) {
    %c0_i32 = arith.constant 0 : i32
    %c0_i32_0 = arith.constant 0 : i32
    %c0_i32_1 = arith.constant 0 : i32
    return %c0_i32, %c0_i32_0 : i32, i32
  }
  func.func @transform_2(%arg0: i32) -> (i32, i32) {
    %c0_i32 = arith.constant 0 : i32
    %c0_i32_0 = arith.constant 0 : i32
    %c0_i32_1 = arith.constant 0 : i32
    return %c0_i32, %c0_i32_0 : i32, i32
  }
  func.func @transform_3(%arg0: i32) -> (i32, i32) {
    %c0_i32 = arith.constant 0 : i32
    %c0_i32_0 = arith.constant 0 : i32
    return %arg0, %c0_i32 : i32, i32
  }
}

</mosaic_0001>

<bundles_post_ra>
// kernel: tpu_custom_call.1
= control target key start
LH: loop header
LB: loop body
LE: loop exit
PB: predicated region body
PF: predicated region fallthrough
CT: control target
= control target key end

     0   :  { %8 = vsyncpa [#allocation3], 0  ;;  %s163_s0 = inlined_call_operand.hbm [shape: f32[2,128], index: 0, kind: input, shape index: {}]   ;;  %s164_s1 = inlined_call_operand.vmem [shape: f32[1,128], index: 1, kind: input, shape index: {}]   ;;  %s165_s2 = inlined_call_operand.vmem [shape: f32[1,128], index: 2, kind: input, shape index: {}]   ;;  %s166_s3 = inlined_call_operand.hbm [shape: f32[2,128], index: 3, kind: output, shape index: {}]  }
   0x1   :  { %9 = vsyncpa [#allocation4], 0  ;;  %s129_s12 = smov [#allocation2]  }
   0x2   :  { %s16_s13 = sshll.u32 %s129_s12, 4  ;;  %s17_s13 = int_to_ptr.vmem [resolvable:$true] %s16_s13 }
   0x3   :  { %s93_s14 = scalar_lea.vmem %s17_s13, 32  ;;  %p98_p1 = scmp.lt.s32.totalorder %s17_s13, %s17_s13 }
   0x4   :  { %p94_p0 = scmp.ne.s32.totalorder %s17_s13, %s93_s14  ;;  %p99_p2 = scmp.lt.s32.totalorder %s93_s14, %s93_s14 }
   0x6   :  { %p100_p3 = por %p99_p2, %p98_p1 }
   0x8   :  { %p101_p4 = pnand %p100_p3, %p94_p0 }
   0xa   :  { %104 = shalt.err (!%p101_p4)
}
   0xb   :  { %19 = dma.hbm_to_vmem [thread:$0]  %s163_s0, 32, %s17_s13, [#allocation3]  }
   0xc   :  { %125 = dma.done.wait [#allocation3], 32  }
   0xd   :  { %126 = vsyncadd [#allocation3], 4294967264  ;;  %v28_v0 = vlaneseq  ;;  %vm32_vm1 = vcmask 1041408   ;;  %v27_v2 = vld [vmem:[#allocation2] sm:$0x3]  ;;  %s130_s20 = smov [#allocation5]  }
   0xe   :  { %v79_v15 = vld [vmem:[%s164_s1] ss:$0 sm:$0xff]  ;;  %s70_s21 = sshll.u32 %s130_s20, 4  ;;  %s71_s21 = int_to_ptr.vmem [resolvable:$true] %s70_s21 }
   0xf   :  { %v29_v1 = vand.u32 127, %v28_v0  ;;  %v80_v17 = vld [vmem:[%s165_s2] ss:$0 sm:$0xff]  ;;  %s105_s22 = scalar_lea.vmem %s71_s21, 32  ;;  %p110_p6 = scmp.lt.s32.totalorder %s71_s21, %s71_s21 }
  0x10   :  { %p106_p5 = scmp.ne.s32.totalorder %s71_s21, %s105_s22  ;;  %p111_p7 = scmp.lt.s32.totalorder %s105_s22, %s105_s22 }
  0x11   :  { %vm30_vm0 = vcmp.lt.s32.totalorder %v29_v1, 5 }
  0x12   :  { %v31_v3 = vsel %vm30_vm0, %v27_v2, 0.0  ;;  %p112_p8 = por %p111_p7, %p110_p6 }
  0x13   :  { %v33_v4 = vsel %vm32_vm1, %v31_v3, 0.0 }
  0x14   :  { %34 = vadd.xlane.f32.xlu0 %v33_v4  ;;  %p113_p9 = pnand %p112_p8, %p106_p5 }
  0x9d   :  { %v35_v5 = vpop.xlane.xlu0 %34 }
  0x9e   :  { %v36_v6 = vmul.f32 0.2, %v35_v5 }
  0xa0   :  { %v37_v7 = vsub.f32 %v31_v3, %v36_v6 }
  0xa2   :  { %v38_v8 = vsel %vm30_vm0, %v37_v7, 0.0 }
  0xa3   :  { %v39_v9 = vmul.f32 %v38_v8, %v38_v8 }
  0xa5   :  { %v40_v10 = vsel %vm32_vm1, %v39_v9, 0.0 }
  0xa6   :  { %41 = vadd.xlane.f32.xlu0 %v40_v10 }
 0x12f   :  { %v42_v11 = vpop.xlane.xlu0 %41 }
 0x130   :  { %v43_v12 = vmul.f32 0.2, %v42_v11 }
 0x132   :  { %v44_v13 = vadd.f32 1e-05, %v43_v12 }
 0x134   :  { %83 = vrsqrt.f32 %v44_v13 }
 0x141   :  { %v84_v14 = vpop.eup %83 }
 0x142   :  { %v47_v16 = vmul.f32 %v84_v14, %v38_v8 }
 0x144   :  { %v54_v18 = vmul.f32 %v79_v15, %v47_v16 }
 0x146   :  { %v62_v19 = vadd.f32 %v80_v17, %v54_v18 }
 0x148   :  { %63 = vst [vmem:[#allocation5] sm:$0x3] %v62_v19 }
 0x149   :  { %116 = shalt.err (!%p113_p9)
}
 0x14a   :  { %73 = dma.vmem_to_hbm [thread:$0]  %s71_s21, 32, %s166_s3, [#allocation4]  }
 0x14b   :  { %127 = dma.done.wait [#allocation4], 32  }
 0x14c   :  { %128 = vsyncadd [#allocation4], 4294967264 }
 0x14d   :  { %77 = vsyncpa [#allocation3], 1 }
 0x14e   :  { %78 = vsyncpa [#allocation4], 1 }

</bundles_post_ra>
